<compile_context>
chip_gen: v6e
topology: v6e:2x2x1
jax: 0.10.0
libtpu: 0.0.40
codegen_flags: <defaults>
</compile_context>

<pallas_src>
import functools

import jax
import jax.numpy as jnp
from jax.experimental import pallas as pl
from jax.experimental.pallas import tpu as pltpu


def _round_up(x, m):
    return (x + m - 1) // m * m


def _cdiv(a, b):
    return (a + b - 1) // b


def similarity_kernel(lvec_ref, rvec_ref, w1_ref, w2_ref, wp_ref, b_ref,
                      out_ref, *, hp, cp):
    # Inputs arrive bf16 (half the HBM read); upcast for exact VPU math.
    l = lvec_ref[...].astype(jnp.float32)    # (TB, K)
    r = rvec_ref[...].astype(jnp.float32)

    # Elementwise distance features in f32 (VPU); cast to bf16 only for the MXU.
    mult_dist = (l * r).astype(jnp.bfloat16)             # torch.mul(lvec, rvec)
    abs_dist = jnp.abs(l - r).astype(jnp.bfloat16)       # torch.abs(lvec - rvec)

    # wh(cat([mult, abs], dim=1)) without materializing the concat:
    # cat([m, a], 1) @ W == m @ W_top + a @ W_bottom.
    h = (jnp.dot(mult_dist, w1_ref[...], preferred_element_type=jnp.float32)
         + jnp.dot(abs_dist, w2_ref[...], preferred_element_type=jnp.float32)
         + b_ref[0:1, :hp])                  # (TB, Hp) f32

    # Numerically stable sigmoid: single EUP tanh, no inf edge case.
    h = 0.5 * jnp.tanh(0.5 * h) + 0.5

    # wp(h). Padded class lanes carry a -1e30 bias so they vanish in softmax.
    logits = (jnp.dot(h.astype(jnp.bfloat16), wp_ref[...],
                      preferred_element_type=jnp.float32)
              + b_ref[1:2, :cp])             # (TB, Cp) f32

    # log_softmax along the class axis (last dim).
    m = jnp.max(logits, axis=-1, keepdims=True)
    shifted = logits - m
    lse = jnp.log(jnp.sum(jnp.exp(shifted), axis=-1, keepdims=True))
    out_ref[...] = shifted - lse


def prepare_similarity_params(wh_w, wh_b, wp_w, wp_b):
    """One-time parameter prep (not per forward call).

    wh_w: (2*mem_dim, H), wh_b: (H,), wp_w: (H, C), wp_b: (C,), all stored
    (in_features, out_features) i.e. transposed vs. PyTorch."""
    two_k, hidden = wh_w.shape
    k = two_k // 2
    num_classes = wp_w.shape[1]
    hp = _round_up(hidden, 128)      # 128-lane padding only (kernel is HBM-bound)
    cp = _round_up(num_classes, 128)
    bw = max(hp, cp)

    w1 = jnp.zeros((k, hp), jnp.bfloat16).at[:, :hidden].set(
        wh_w[:k].astype(jnp.bfloat16))            # acts on mult_dist
    w2 = jnp.zeros((k, hp), jnp.bfloat16).at[:, :hidden].set(
        wh_w[k:].astype(jnp.bfloat16))            # acts on abs_dist
    wp = jnp.zeros((hp, cp), jnp.bfloat16).at[:hidden, :num_classes].set(
        wp_w.astype(jnp.bfloat16))

    bias = jnp.zeros((2, bw), jnp.float32)
    bias = bias.at[0, :hidden].set(wh_b.astype(jnp.float32))
    bias = bias.at[1, :].set(-1e30)               # padded classes -> excluded
    bias = bias.at[1, :num_classes].set(wp_b.astype(jnp.float32))

    meta = dict(K=k, H=hidden, C=num_classes, Hp=hp, Cp=cp, BW=bw)
    return (w1, w2, wp, bias), meta


def similarity_forward(lvec, rvec, params, meta, *, block_rows=2048):
    """lvec, rvec: (B, mem_dim), f32 or bf16. params/meta from
    prepare_similarity_params."""
    w1, w2, wp, bias = params
    k, c = meta["K"], meta["C"]
    hp, cp, bw = meta["Hp"], meta["Cp"], meta["BW"]
    b = lvec.shape[0]
    assert lvec.shape == rvec.shape == (b, k)

    # bf16 input stream (halves the dominant HBM read).  Ideally the upstream
    # TreeLSTM already emits bf16; cast here only if it does not.
    if lvec.dtype != jnp.bfloat16:
        lvec = lvec.astype(jnp.bfloat16)
    if rvec.dtype != jnp.bfloat16:
        rvec = rvec.astype(jnp.bfloat16)

    # Batch tiling: bound per-tile padding to < 8 rows, and force >= 2 grid
    # steps when the batch is big enough so v7x's two TensorCores both work.
    n_tiles = _cdiv(b, block_rows)
    if n_tiles < 2 and b >= 16:
        n_tiles = 2
    tb = _round_up(_cdiv(b, n_tiles), 8)
    n_tiles = _cdiv(b, tb)
    b_pad = n_tiles * tb
    if b_pad != b:
        pad = ((0, b_pad - b), (0, 0))
        lvec = jnp.pad(lvec, pad)
        rvec = jnp.pad(rvec, pad)
    grid = (n_tiles,)

    # Explicit VMEM budget: double-buffered bf16 inputs + f32 output tile +
    # resident weights/biases + in-kernel temporaries (conservative), +25%.
    bytes_in = 2 * 2 * tb * k * 2                       # lvec+rvec, 2 bufs, bf16
    bytes_out = 2 * tb * cp * 4                         # output, 2 bufs, f32
    bytes_w = 2 * ((2 * k * hp + hp * cp) * 2 + 2 * bw * 4)
    bytes_tmp = tb * (2 * k * 4 + 2 * k * 2 + (hp + 3 * cp) * 4)
    vmem_limit = int((bytes_in + bytes_out + bytes_w + bytes_tmp) * 1.25)
    vmem_limit = max(vmem_limit, 16 << 20)
    vmem_limit = min(vmem_limit, 40 << 20)              # stays under v7x physical

    kernel = functools.partial(similarity_kernel, hp=hp, cp=cp)

    flops = 2 * b_pad * k * hp * 2 + 2 * b_pad * hp * cp + 8 * b_pad * k
    transcendentals = b_pad * (hp + cp + 1)             # tanh + exp + log
    bytes_accessed = (2 * b_pad * k * 2                 # lvec, rvec (bf16)
                      + (2 * k * hp + hp * cp) * 2      # bf16 weights
                      + 2 * bw * 4                      # merged biases
                      + b_pad * cp * 4)                 # output (f32)

    out_padded = pl.pallas_call(
        kernel,
        out_shape=jax.ShapeDtypeStruct((b_pad, cp), jnp.float32),
        grid_spec=pltpu.PrefetchScalarGridSpec(
            num_scalar_prefetch=0,
            grid=grid,
            in_specs=[
                pl.BlockSpec((tb, k), lambda i: (i, 0)),    # lvec tile (bf16)
                pl.BlockSpec((tb, k), lambda i: (i, 0)),    # rvec tile (bf16)
                pl.BlockSpec((k, hp), lambda i: (0, 0)),    # w1 (VMEM-resident)
                pl.BlockSpec((k, hp), lambda i: (0, 0)),    # w2 (VMEM-resident)
                pl.BlockSpec((hp, cp), lambda i: (0, 0)),   # wp (VMEM-resident)
                pl.BlockSpec((2, bw), lambda i: (0, 0)),    # biases (resident)
            ],
            out_specs=pl.BlockSpec((tb, cp), lambda i: (i, 0)),
        ),
        compiler_params=pltpu.CompilerParams(
            dimension_semantics=("parallel",),
            vmem_limit_bytes=vmem_limit),
        cost_estimate=pl.CostEstimate(
            flops=flops,
            transcendentals=transcendentals,
            bytes_accessed=bytes_accessed),
    )(lvec, rvec, w1, w2, wp, bias)

    return out_padded[:b, :c]


def similarity_reference(lvec, rvec, wh_w, wh_b, wp_w, wp_b):
    mult = lvec * rvec
    absd = jnp.abs(lvec - rvec)
    vec_dist = jnp.concatenate([mult, absd], axis=1)
    h = jax.nn.sigmoid(vec_dist @ wh_w + wh_b)
    logits = h @ wp_w + wp_b
    return jax.nn.log_softmax(logits, axis=1)


if __name__ == "__main__":
    mem_dim = 462            # fixed by wh = nn.Linear(924, hidden_dim)
    hidden_dim = 32
    num_classes = 5

    key = jax.random.PRNGKey(0)
    k1, k2, k3, k4, k5, k6 = jax.random.split(key, 6)

    # Deterministic synthetic parameters (PyTorch-Linear-style uniform init),
    # stored as (in_features, out_features).
    bound_h = 1.0 / jnp.sqrt(924.0)
    wh_w = jax.random.uniform(k3, (924, hidden_dim), jnp.float32,
                              -bound_h, bound_h)
    wh_b = jax.random.uniform(k4, (hidden_dim,), jnp.float32,
                              -bound_h, bound_h)
    bound_p = 1.0 / jnp.sqrt(float(hidden_dim))
    wp_w = jax.random.uniform(k5, (hidden_dim, num_classes), jnp.float32,
                              -bound_p, bound_p)
    wp_b = jax.random.uniform(k6, (num_classes,), jnp.float32,
                              -bound_p, bound_p)

    # One-time parameter prep (pre-split / pre-pad / bf16 / merged biases).
    params, meta = prepare_similarity_params(wh_w, wh_b, wp_w, wp_b)

    # Two batch sizes: 8 (single tile) and 20 (forces 2 grid steps + padding,
    # exercising the new tile rule / megacore path).
    for batch in (8, 20):
        kb1, kb2 = jax.random.split(jax.random.PRNGKey(batch), 2)
        lvec = jax.random.normal(kb1, (batch, mem_dim), dtype=jnp.float32)
        rvec = jax.random.normal(kb2, (batch, mem_dim), dtype=jnp.float32)

        out = similarity_forward(lvec, rvec, params, meta)
        out = jax.block_until_ready(out)

        ref = similarity_reference(lvec, rvec, wh_w, wh_b, wp_w, wp_b)
        assert out.shape == (batch, num_classes)
        err = float(jnp.max(jnp.abs(out - ref)))
        # bf16 input stream + bf16 MXU operands vs. a pure-f32 reference.
        assert err < 5e-2, f"batch={batch}: max abs err = {err}"

    print("KERNEL_OK")
</pallas_src>

<mosaic_0001>
module attributes {stable_mosaic.version = 11 : i64} {
  func.func @similarity_kernel(%arg0: i32, %arg1: memref<8x462xbf16, #tpu.memory_space<vmem>>, %arg2: memref<8x462xbf16, #tpu.memory_space<vmem>>, %arg3: memref<462x128xbf16, #tpu.memory_space<vmem>>, %arg4: memref<462x128xbf16, #tpu.memory_space<vmem>>, %arg5: memref<128x128xbf16, #tpu.memory_space<vmem>>, %arg6: memref<2x128xf32, #tpu.memory_space<vmem>>, %arg7: memref<8x128xf32, #tpu.memory_space<vmem>>) attributes {dimension_semantics = [#tpu.dimension_semantics<parallel>], iteration_bounds = array<i64: 1>, scalar_prefetch = 0 : i64, scratch_operands = 0 : i64, tpu.core_type = #tpu.core_type<tc>, window_params = [{transform_indices = @transform_0, window_bounds = array<i64: 8, 462>}, {transform_indices = @transform_1, window_bounds = array<i64: 8, 462>}, {pipeline_mode = #tpu.pipeline_mode<synchronous>, transform_indices = @transform_2, window_bounds = array<i64: 462, 128>}, {pipeline_mode = #tpu.pipeline_mode<synchronous>, transform_indices = @transform_3, window_bounds = array<i64: 462, 128>}, {pipeline_mode = #tpu.pipeline_mode<synchronous>, transform_indices = @transform_4, window_bounds = array<i64: 128, 128>}, {pipeline_mode = #tpu.pipeline_mode<synchronous>, transform_indices = @transform_5, window_bounds = array<i64: 2, 128>}, {transform_indices = @transform_6, window_bounds = array<i64: 8, 128>}]} {
    %c0 = arith.constant 0 : index
    %c0_0 = arith.constant 0 : index
    %0 = vector.load %arg1[%c0, %c0_0] : memref<8x462xbf16, #tpu.memory_space<vmem>>, vector<8x462xbf16>
    %1 = arith.extf %0 : vector<8x462xbf16> to vector<8x462xf32>
    %c0_1 = arith.constant 0 : index
    %c0_2 = arith.constant 0 : index
    %2 = vector.load %arg2[%c0_1, %c0_2] : memref<8x462xbf16, #tpu.memory_space<vmem>>, vector<8x462xbf16>
    %3 = arith.extf %2 : vector<8x462xbf16> to vector<8x462xf32>
    %4 = arith.mulf %1, %3 : vector<8x462xf32>
    %5 = arith.truncf %4 : vector<8x462xf32> to vector<8x462xbf16>
    %6 = arith.subf %1, %3 : vector<8x462xf32>
    %7 = math.absf %6 : vector<8x462xf32>
    %8 = arith.truncf %7 : vector<8x462xf32> to vector<8x462xbf16>
    %c0_3 = arith.constant 0 : index
    %c0_4 = arith.constant 0 : index
    %9 = vector.load %arg3[%c0_3, %c0_4] : memref<462x128xbf16, #tpu.memory_space<vmem>>, vector<462x128xbf16>
    %cst = arith.constant dense<0.000000e+00> : vector<8x128xf32>
    %10 = tpu.matmul %5, %9, %cst {dimension_numbers = #tpu.dot_dimension_numbers<[1], [0], [0], [1], [0, 0, 1, 1], [], []>} : vector<8x462xbf16>, vector<462x128xbf16>, vector<8x128xf32> -> vector<8x128xf32>
    %c0_5 = arith.constant 0 : index
    %c0_6 = arith.constant 0 : index
    %11 = vector.load %arg4[%c0_5, %c0_6] : memref<462x128xbf16, #tpu.memory_space<vmem>>, vector<462x128xbf16>
    %cst_7 = arith.constant dense<0.000000e+00> : vector<8x128xf32>
    %12 = tpu.matmul %8, %11, %cst_7 {dimension_numbers = #tpu.dot_dimension_numbers<[1], [0], [0], [1], [0, 0, 1, 1], [], []>} : vector<8x462xbf16>, vector<462x128xbf16>, vector<8x128xf32> -> vector<8x128xf32>
    %13 = arith.addf %10, %12 : vector<8x128xf32>
    %c0_8 = arith.constant 0 : index
    %c0_9 = arith.constant 0 : index
    %14 = vector.load %arg6[%c0_8, %c0_9] : memref<2x128xf32, #tpu.memory_space<vmem>>, vector<1x128xf32>
    %15 = vector.broadcast %14 : vector<1x128xf32> to vector<8x128xf32>
    %16 = arith.addf %13, %15 : vector<8x128xf32>
    %cst_10 = arith.constant 5.000000e-01 : f32
    %17 = vector.broadcast %cst_10 : f32 to vector<8x128xf32>
    %18 = arith.mulf %17, %16 : vector<8x128xf32>
    %19 = math.tanh %18 : vector<8x128xf32>
    %cst_11 = arith.constant 5.000000e-01 : f32
    %20 = vector.broadcast %cst_11 : f32 to vector<8x128xf32>
    %21 = arith.mulf %20, %19 : vector<8x128xf32>
    %cst_12 = arith.constant 5.000000e-01 : f32
    %22 = vector.broadcast %cst_12 : f32 to vector<8x128xf32>
    %23 = arith.addf %21, %22 : vector<8x128xf32>
    %24 = arith.truncf %23 : vector<8x128xf32> to vector<8x128xbf16>
    %c0_13 = arith.constant 0 : index
    %c0_14 = arith.constant 0 : index
    %25 = vector.load %arg5[%c0_13, %c0_14] : memref<128x128xbf16, #tpu.memory_space<vmem>>, vector<128x128xbf16>
    %cst_15 = arith.constant dense<0.000000e+00> : vector<8x128xf32>
    %26 = tpu.matmul %24, %25, %cst_15 {dimension_numbers = #tpu.dot_dimension_numbers<[1], [0], [0], [1], [0, 0, 1, 1], [], []>} : vector<8x128xbf16>, vector<128x128xbf16>, vector<8x128xf32> -> vector<8x128xf32>
    %c1 = arith.constant 1 : index
    %c0_16 = arith.constant 0 : index
    %27 = vector.load %arg6[%c1, %c0_16] : memref<2x128xf32, #tpu.memory_space<vmem>>, vector<1x128xf32>
    %28 = vector.broadcast %27 : vector<1x128xf32> to vector<8x128xf32>
    %29 = arith.addf %26, %28 : vector<8x128xf32>
    %cst_17 = arith.constant dense<0xFF800000> : vector<8xf32>
    %30 = vector.multi_reduction <maximumf>, %29, %cst_17 [1] : vector<8x128xf32> to vector<8xf32>
    %31 = vector.shape_cast %30 : vector<8xf32> to vector<8x1xf32>
    %32 = vector.broadcast %31 : vector<8x1xf32> to vector<8x128xf32>
    %33 = arith.subf %29, %32 : vector<8x128xf32>
    %34 = math.exp %33 : vector<8x128xf32>
    %cst_18 = arith.constant dense<0.000000e+00> : vector<8xf32>
    %35 = vector.multi_reduction <add>, %34, %cst_18 [1] : vector<8x128xf32> to vector<8xf32>
    %36 = vector.shape_cast %35 : vector<8xf32> to vector<8x1xf32>
    %37 = math.log %36 : vector<8x1xf32>
    %38 = vector.broadcast %37 : vector<8x1xf32> to vector<8x128xf32>
    %39 = arith.subf %33, %38 : vector<8x128xf32>
    %c0_19 = arith.constant 0 : index
    %c0_20 = arith.constant 0 : index
    %40 = vector.load %arg7[%c0_19, %c0_20] : memref<8x128xf32, #tpu.memory_space<vmem>>, vector<8x128xf32>
    tpu.vector_store %arg7[%c0_19, %c0_20], %39 {strides = array<i32>} : memref<8x128xf32, #tpu.memory_space<vmem>>, vector<8x128xf32>,
    return
  }
  func.func @transform_0(%arg0: i32) -> (i32, i32) {
    %c0_i32 = arith.constant 0 : i32
    %c0_i32_0 = arith.constant 0 : i32
    return %arg0, %c0_i32 : i32, i32
  }
  func.func @transform_1(%arg0: i32) -> (i32, i32) {
    %c0_i32 = arith.constant 0 : i32
    %c0_i32_0 = arith.constant 0 : i32
    return %arg0, %c0_i32 : i32, i32
  }
  func.func @transform_2(%arg0: i32) -> (i32, i32) {
    %c0_i32 = arith.constant 0 : i32
    %c0_i32_0 = arith.constant 0 : i32
    %c0_i32_1 = arith.constant 0 : i32
    return %c0_i32, %c0_i32_0 : i32, i32
  }
  func.func @transform_3(%arg0: i32) -> (i32, i32) {
    %c0_i32 = arith.constant 0 : i32
    %c0_i32_0 = arith.constant 0 : i32
    %c0_i32_1 = arith.constant 0 : i32
    return %c0_i32, %c0_i32_0 : i32, i32
  }
  func.func @transform_4(%arg0: i32) -> (i32, i32) {
    %c0_i32 = arith.constant 0 : i32
    %c0_i32_0 = arith.constant 0 : i32
    %c0_i32_1 = arith.constant 0 : i32
    return %c0_i32, %c0_i32_0 : i32, i32
  }
  func.func @transform_5(%arg0: i32) -> (i32, i32) {
    %c0_i32 = arith.constant 0 : i32
    %c0_i32_0 = arith.constant 0 : i32
    %c0_i32_1 = arith.constant 0 : i32
    return %c0_i32, %c0_i32_0 : i32, i32
  }
  func.func @transform_6(%arg0: i32) -> (i32, i32) {
    %c0_i32 = arith.constant 0 : i32
    %c0_i32_0 = arith.constant 0 : i32
    return %arg0, %c0_i32 : i32, i32
  }
}

</mosaic_0001>

<bundles_post_ra>
// kernel: tpu_custom_call.1
= control target key start
LH: loop header
LB: loop body
LE: loop exit
PB: predicated region body
PF: predicated region fallthrough
CT: control target
= control target key end

     0   :  { %11 = vsyncpa [#allocation3], 0  ;;  %s1400_s0 = inlined_call_operand.hbm [shape: bf16[8,462], index: 0, kind: input, shape index: {}]   ;;  %s1401_s1 = inlined_call_operand.hbm [shape: bf16[8,462], index: 1, kind: input, shape index: {}]   ;;  %s1402_s2 = inlined_call_operand.hbm [shape: bf16[462,128], index: 2, kind: input, shape index: {}]   ;;  %s1403_s3 = inlined_call_operand.hbm [shape: bf16[462,128], index: 3, kind: input, shape index: {}]   ;;  %s1404_s4 = inlined_call_operand.hbm [shape: bf16[128,128], index: 4, kind: input, shape index: {}]   ;;  %s1405_s5 = inlined_call_operand.vmem [shape: f32[2,128], index: 5, kind: input, shape index: {}]   ;;  %s1406_s6 = inlined_call_operand.hbm [shape: f32[8,128], index: 6, kind: output, shape index: {}]  }
   0x1   :  { %12 = vsyncpa [#allocation6], 0 }
   0x2   :  { %13 = vsyncpa [#allocation9], 0 }
   0x3   :  { %14 = vsyncpa [#allocation4], 0  ;;  %s1259_s21 = smov [#allocation5]  }
   0x4   :  { %s31_s22 = sshll.u32 %s1259_s21, 4  ;;  %s32_s22 = int_to_ptr.vmem [resolvable:$true] %s31_s22 }
   0x5   :  { %s1139_s23 = scalar_lea.vmem %s32_s22, 256  ;;  %p1144_p1 = scmp.lt.s32.totalorder %s32_s22, %s32_s22 }
   0x6   :  { %p1140_p0 = scmp.ne.s32.totalorder %s32_s22, %s1139_s23  ;;  %p1145_p2 = scmp.lt.s32.totalorder %s1139_s23, %s1139_s23 }
   0x8   :  { %p1146_p3 = por %p1145_p2, %p1144_p1 }
   0xa   :  { %p1147_p4 = pnand %p1146_p3, %p1140_p0 }
   0xc   :  { %1150 = shalt.err (!%p1147_p4)
}
   0xd   :  { %34 = dma.hbm_to_vmem [thread:$0]  %s1401_s1, 256, %s32_s22, [#allocation6]  }
   0xe   :  { %s1260_s26 = smov [#allocation8]   ;;  %s1261_s28 = smov [#allocation2]  }
   0xf   :  { %s52_s27 = sshll.u32 %s1260_s26, 4  ;;  %s21_s29 = sshll.u32 %s1261_s28, 4  ;;  %s53_s27 = int_to_ptr.vmem [resolvable:$true] %s52_s27  ;;  %s22_s29 = int_to_ptr.vmem [resolvable:$true] %s21_s29 }
  0x10   :  { %s1159_s30 = scalar_lea.vmem %s53_s27, 3712  ;;  %p1164_p6 = scmp.lt.s32.totalorder %s53_s27, %s53_s27 }
  0x11   :  { %p1160_p5 = scmp.ne.s32.totalorder %s53_s27, %s1159_s30  ;;  %p1165_p7 = scmp.lt.s32.totalorder %s1159_s30, %s1159_s30 }
  0x13   :  { %p1166_p8 = por %p1165_p7, %p1164_p6 }
  0x15   :  { %p1167_p9 = pnand %p1166_p8, %p1160_p5 }
  0x17   :  { %1170 = shalt.err (!%p1167_p9)
}
  0x18   :  { %s1262_s7 = smov 64   ;;  %s1263_s8 = smov 4  }
  0x19   :  { %58 = dma.hbm_to_vmem [thread:$0]  %s1403_s3, 3712, %s53_s27, [#allocation9], %s1262_s7, %s1262_s7, %s1263_s8  }
  0x1a   :  { %s1179_s1 = scalar_lea.vmem %s22_s29, 256  ;;  %p1184_p11 = scmp.lt.s32.totalorder %s22_s29, %s22_s29 }
  0x1b   :  { %p1180_p10 = scmp.ne.s32.totalorder %s22_s29, %s1179_s1  ;;  %p1185_p12 = scmp.lt.s32.totalorder %s1179_s1, %s1179_s1 }
  0x1d   :  { %p1186_p13 = por %p1185_p12, %p1184_p11 }
  0x1f   :  { %p1187_p0 = pnand %p1186_p13, %p1180_p10 }
  0x21   :  { %1190 = shalt.err (!%p1187_p0)
}
  0x22   :  { %24 = dma.hbm_to_vmem [thread:$0]  %s1400_s0, 256, %s22_s29, [#allocation3]  }
  0x23   :  { %s1264_s13 = smov [#allocation7]   ;;  %s1265_s15 = smov [#allocation10]  }
  0x24   :  { %s40_s14 = sshll.u32 %s1264_s13, 4  ;;  %s64_s16 = sshll.u32 %s1265_s15, 4  ;;  %s41_s14 = int_to_ptr.vmem [resolvable:$true] %s40_s14  ;;  %s65_s16 = int_to_ptr.vmem [resolvable:$true] %s64_s16 }
  0x25   :  { %s1199_s17 = scalar_lea.vmem %s41_s14, 3712  ;;  %p1204_p2 = scmp.lt.s32.totalorder %s41_s14, %s41_s14 }
  0x26   :  { %p1200_p1 = scmp.ne.s32.totalorder %s41_s14, %s1199_s17  ;;  %p1205_p3 = scmp.lt.s32.totalorder %s1199_s17, %s1199_s17 }
  0x28   :  { %p1206_p4 = por %p1205_p3, %p1204_p2 }
  0x2a   :  { %p1207_p5 = pnand %p1206_p4, %p1200_p1 }
  0x2c   :  { %1210 = shalt.err (!%p1207_p5)
}
  0x2d   :  { %46 = dma.hbm_to_vmem [thread:$0]  %s1402_s2, 3712, %s41_s14, [#allocation6], %s1262_s7, %s1262_s7, %s1263_s8  }
  0x2e   :  { %s1219_s0 = scalar_lea.vmem %s65_s16, 1024  ;;  %p1224_p7 = scmp.lt.s32.totalorder %s65_s16, %s65_s16 }
  0x2f   :  { %p1220_p6 = scmp.ne.s32.totalorder %s65_s16, %s1219_s0  ;;  %p1225_p8 = scmp.lt.s32.totalorder %s1219_s0, %s1219_s0 }
  0x31   :  { %p1226_p9 = por %p1225_p8, %p1224_p7 }
  0x33   :  { %p1227_p10 = pnand %p1226_p9, %p1220_p6 }
  0x35   :  { %1230 = shalt.err (!%p1227_p10)
}
  0x36   :  { %70 = dma.hbm_to_vmem [thread:$0]  %s1404_s4, 1024, %s65_s16, [#allocation9], %s1262_s7, %s1262_s7, %s1263_s8  }
  0x37   :  { %1251 = dma.done.wait [#allocation3], 256  }
  0x38   :  { %1252 = vsyncadd [#allocation3], 4294967040 }
  0x39   :  { %1253 = dma.done.wait [#allocation6], 3968  }
  0x3a   :  { %1254 = vsyncadd [#allocation6], 4294963328 }
  0x3b   :  { %1255 = dma.done.wait [#allocation9], 4736  }
  0x3c   :  { %1256 = vsyncadd [#allocation9], 4294962560  ;;  %v1266_v0 = vmov 0   ;;  %v1059_v1 = vld [vmem:[#allocation8 + $0x78] sm:$0xff]   ;;  %v1062_v4 = vld [vmem:[#allocation8 + $0x70] sm:$0xff]   ;;  %vm414_vm0 = vcmask 1046528  }
  0x3d   :  { %458 = vmatprep.subr.bf16.mxu1 %v1266_v0  ;;  %v1060_v2 = vld [vmem:[#allocation8 + $0xb8] sm:$0xff]   ;;  %975 = vmatprep.subr.bf16.mxu0 %v1059_v1  ;;  %v1063_v5 = vld [vmem:[#allocation8 + $0xb0] sm:$0xff]   ;;  %v1065_v7 = vld [vmem:[#allocation8 + $0x68] sm:$0xff]   ;;  %vm410_vm1 = vcmask 637952   ;;  %vm1268_vm2 = vmmov 0   ;;  %s1269_s23 = smov [#allocation11]  }
  0x3e   :  { %v1061_v3 = vld [vmem:[#allocation8 + $0x38] sm:$0xff]   ;;  %459 = vmatpush1.bf16.msra.mxu1 %v1060_v2  ;;  %v1064_v6 = vld [vmem:[#allocation8 + $0x30] sm:$0xff]   ;;  %v1066_v8 = vld [vmem:[#allocation8 + $0xa8] sm:$0xff]   ;;  %s894_s24 = sshll.u32 %s1269_s23, 4  ;;  %s895_s24 = int_to_ptr.vmem [resolvable:$true] %s894_s24 }
  0x3f   :  { %976 = vmatpush3.bf16.msra.mxu0 %v1061_v3  ;;  %460 = vmatprep.subr.bf16.mxu1 %v1266_v0  ;;  %v1067_v9 = vld [vmem:[#allocation8 + $0x28] sm:$0xff]   ;;  %v1068_v10 = vld [vmem:[#allocation8 + $0x60] sm:$0xff]   ;;  %v1071_v13 = vld [vmem:[#allocation8 + $0x58] sm:$0xff]   ;;  %p1236_p12 = scmp.lt.s32.totalorder %s895_s24, %s895_s24 }
  0x40   :  { %977 = vmatprep.subr.bf16.mxu0 %v1062_v4  ;;  %v1069_v11 = vld [vmem:[#allocation8 + $0xa0] sm:$0xff]   ;;  %v1072_v14 = vld [vmem:[#allocation8 + $0x98] sm:$0xff]   ;;  %v1074_v16 = vld [vmem:[#allocation8 + $0x50] sm:$0xff]  }
  0x41   :  { %v1070_v12 = vld [vmem:[#allocation8 + $0x20] sm:$0xff]   ;;  %v1073_v15 = vld [vmem:[#allocation8 + $0x18] sm:$0xff]   ;;  %v1075_v17 = vld [vmem:[#allocation8 + $0x90] sm:$0xff]  }
  0x42   :  { %461 = vmatpush1.bf16.msra.mxu1 %v1063_v5  ;;  %v1076_v18 = vld [vmem:[#allocation8 + $0x10] sm:$0xff]   ;;  %v1077_v19 = vld [vmem:[#allocation8 + $0x48] sm:$0xff]   ;;  %v1080_v22 = vld [vmem:[#allocation8 + $0x40] sm:$0xff]  }
  0x43   :  { %978 = vmatpush3.bf16.msra.mxu0 %v1064_v6  ;;  %462 = vmatprep.subr.bf16.mxu1 %v1266_v0  ;;  %v1078_v20 = vld [vmem:[#allocation8 + $0x88] sm:$0xff]   ;;  %v1336_v23 = vld [vmem:[#allocation2] sm:$0xff]  ;;  %v1081_v25 = vld [vmem:[#allocation8 + $0x80] sm:$0xff]  }
  0x44   :  { %979 = vmatprep.subr.bf16.mxu0 %v1065_v7  ;;  %v1079_v21 = vld [vmem:[#allocation8 + $0x8] sm:$0xff]   ;;  %v91_v26 = vunpack.c.l.bf16 %v1336_v23  ;;  %v92_v27 = vunpack.c.h.bf16 %v1336_v23  ;;  %v1082_v30 = vld [vmem:[#allocation8] sm:$0xff]   ;;  %v1084_v34 = vld [vmem:[#allocation7 + $0x78] sm:$0xff]  }
  0x45   :  { %v1338_v24 = vld [vmem:[#allocation5] sm:$0xff]  ;;  %v1083_v32 = vld [vmem:[#allocation8 + $0xe0] sm:$0x7f]   ;;  %v1085_v41 = vld [vmem:[#allocation7 + $0x38] sm:$0xff]  }
  0x46   :  { %463 = vmatpush1.bf16.msra.mxu1 %v1066_v8  ;;  %v97_v28 = vunpack.c.l.bf16 %v1338_v24  ;;  %v98_v29 = vunpack.c.h.bf16 %v1338_v24  ;;  %v416_v40 = vsel %vm414_vm0, %v1083_v32, 0  ;;  %v1087_v42 = vld [vmem:[#allocation7 + $0x70] sm:$0xff]   ;;  %v1086_v44 = vld [vmem:[#allocation8 + $0xd8] sm:$0xff]   ;;  %v1090_v46 = vld [vmem:[#allocation7 + $0x68] sm:$0xff]  }
  0x47   :  { %980 = vmatpush3.bf16.msra.mxu0 %v1067_v9  ;;  %464 = vmatprep.subr.bf16.mxu1 %v1266_v0  ;;  %v1088_v45 = vld [vmem:[#allocation7 + $0x30] sm:$0xff]   ;;  %v1089_v47 = vld [vmem:[#allocation8 + $0xd0] sm:$0xff]   ;;  %v1091_v48 = vld [vmem:[#allocation7 + $0x28] sm:$0xff]  }
  0x48   :  { %981 = vmatprep.subr.bf16.mxu0 %v1068_v10  ;;  %v110_v31 = vsub.f32 %v92_v27, %v98_v29  ;;  %v109_v33 = vsub.f32 %v91_v26, %v97_v28  ;;  %v102_v37 = vmul.f32 %v98_v29, %v92_v27  ;;  %v1353_v49 = vld [vmem:[#allocation2 + $0x8] sm:$0xff]  ;;  %v1355_v50 = vld [vmem:[#allocation5 + $0x8] sm:$0xff]  ;;  %v1093_v51 = vld [vmem:[#allocation7 + $0x60] sm:$0xff]  }
  0x49   :  { %v93_v52 = vunpack.c.l.bf16 %v1353_v49  ;;  %v94_v53 = vunpack.c.h.bf16 %v1353_v49  ;;  %v99_v54 = vunpack.c.l.bf16 %v1355_v50  ;;  %v100_v55 = vunpack.c.h.bf16 %v1355_v50  ;;  %v1092_v56 = vld [vmem:[#allocation8 + $0xc8] sm:$0xff]   ;;  %v1094_v59 = vld [vmem:[#allocation7 + $0x20] sm:$0xff]   ;;  %v1096_v60 = vld [vmem:[#allocation7 + $0x58] sm:$0xff]  }
  0x4a   :  { %465 = vmatpush1.bf16.msra.mxu1 %v1069_v11  ;;  %v114_v35 = vand.u32 2147483647, %v110_v31  ;;  %v113_v36 = vand.u32 2147483647, %v109_v33  ;;  %v106_v43 = vpack.c.bf16 %v102_v37, %v102_v37  ;;  %v1095_v63 = vld [vmem:[#allocation8 + $0xc0] sm:$0xff]   ;;  %v1097_v3 = vld [vmem:[#allocation7 + $0x18] sm:$0xff]  }
  0x4b   :  { %982 = vmatpush3.bf16.msra.mxu0 %v1070_v12  ;;  %466 = vmatprep.subr.bf16.mxu1 %v1266_v0  ;;  %v112_v57 = vsub.f32 %v94_v53, %v100_v55  ;;  %v111_v58 = vsub.f32 %v93_v52, %v99_v54  ;;  %v104_v1 = vmul.f32 %v100_v55, %v94_v53  ;;  %v1098_v4 = vld [vmem:[#allocation7 + $0x50] sm:$0xff]   ;;  %v1099_v7 = vld [vmem:[#allocation7 + $0xb8] sm:$0xff]   ;;  %v1101_v9 = vld [vmem:[#allocation7 + $0x48] sm:$0xff]   ;;  %v1267_v31 = vmov 0.0  }
  0x4c   :  { %983 = vmatprep.subr.bf16.mxu0 %v1071_v13  ;;  %v118_v38 = vpack.c.bf16 %v114_v35, %v114_v35  ;;  %v117_v39 = vpack.c.bf16 %v113_v36, %v113_v36  ;;  %v1100_v8 = vld [vmem:[#allocation7 + $0x10] sm:$0xff]   ;;  %v1103_v11 = vld [vmem:[#allocation7 + $0x8] sm:$0xff]   ;;  %v1104_v12 = vld [vmem:[#allocation7 + $0x40] sm:$0xff]   ;;  %v101_v13 = vmul.f32 %v97_v28, %v91_v26  ;;  %v103_v27 = vmul.f32 %v99_v54, %v93_v52 }
  0x4d   :  { %v116_v61 = vand.u32 2147483647, %v112_v57  ;;  %v115_v62 = vand.u32 2147483647, %v111_v58  ;;  %v108_v6 = vpack.c.bf16 %v104_v1, %v104_v1  ;;  %v1102_v10 = vld [vmem:[#allocation7 + $0xb0] sm:$0xff]   ;;  %v1113_v24 = vld [vmem:[#allocation7 + $0xd8] sm:$0xff]  }
  0x4e   :  { %467 = vmatpush1.bf16.msra.mxu1 %v1072_v14  ;;  %450 = vmatprep.mubr.bf16.mxu0 %v118_v38  ;;  %v1105_v14 = vld [vmem:[#allocation7 + $0xa8] sm:$0xff]   ;;  %v1116_v28 = vld [vmem:[#allocation7 + $0xc0] sm:$0xff]   ;;  %v107_v29 = vpack.c.bf16 %v103_v27, %v103_v27  ;;  %v1119_v33 = vld [vmem:[#allocation10 + $0x28] sm:$0xff]  }
  0x4f   :  { %984 = vmatpush3.bf16.msra.mxu0 %v1073_v15  ;;  %468 = vmatprep.subr.bf16.mxu1 %v1266_v0  ;;  %v120_v2 = vpack.c.bf16 %v116_v61, %v116_v61  ;;  %v119_v5 = vpack.c.bf16 %v115_v62, %v115_v62  ;;  %v1106_v15 = vld [vmem:[#allocation7] sm:$0xff]   ;;  %v1115_v26 = vld [vmem:[#allocation7 + $0xc8] sm:$0xff]   ;;  %v1123_v36 = vld [vmem:[#allocation10 + $0x8] sm:$0xff]  }
  0x50   :  { %985 = vmatprep.subr.bf16.mxu0 %v1074_v16  ;;  %v1107_v16 = vld [vmem:[#allocation7 + $0xa0] sm:$0xff]   ;;  %v1121_v35 = vld [vmem:[#allocation10 + $0x18] sm:$0xff]   ;;  %v1124_v37 = vld [vmem:[#allocation10] sm:$0xff]  }
  0x51   :  { %934 = vmatprep.mubr.msk.bf16.mxu1 %vm410_vm1, %v120_v2  ;;  %v1118_v32 = vld [vmem:[#allocation10 + $0x30] sm:$0xff]  }
  0x52   :  { %469 = vmatpush1.bf16.msra.mxu1 %v1075_v17  ;;  %v105_v17 = vpack.c.bf16 %v101_v13, %v101_v13  ;;  %v965_v55 = vld [vmem:[%s1405_s5] ss:$0 sm:$0xff] }
  0x53   :  { %986 = vmatpush3.bf16.msra.mxu0 %v1076_v18  ;;  %470 = vmatprep.subr.bf16.mxu1 %v1266_v0  ;;  %v1108_v18 = vld [vmem:[#allocation7 + $0x98] sm:$0xff]  }
  0x54   :  { %987 = vmatprep.subr.bf16.mxu0 %v1077_v19  ;;  %v1109_v19 = vld [vmem:[#allocation7 + $0x90] sm:$0xff]  }
  0x56   :  { %471 = vmatpush1.bf16.msra.mxu1 %v1078_v20  ;;  %v1110_v20 = vld [vmem:[#allocation7 + $0x88] sm:$0xff]  }
  0x57   :  { %988 = vmatpush3.bf16.msra.mxu0 %v1079_v21  ;;  %472 = vmatprep.subr.bf16.mxu1 %v1266_v0  ;;  %v1111_v21 = vld [vmem:[#allocation7 + $0x80] sm:$0xff]  }
  0x58   :  { %989 = vmatprep.subr.bf16.mxu0 %v1080_v22  ;;  %v1112_v22 = vld [vmem:[#allocation7 + $0xe0] sm:$0x7f]  }
  0x59   :  { %v675_v23 = vsel %vm414_vm0, %v1112_v22, 0 }
  0x5a   :  { %473 = vmatpush1.bf16.msra.mxu1 %v1081_v25  ;;  %v1114_v25 = vld [vmem:[#allocation7 + $0xd0] sm:$0xff]  }
  0x5b   :  { %990 = vmatpush3.bf16.msra.mxu0 %v1082_v30  ;;  %480 = vmatprep.subr.bf16.mxu1 %v1266_v0  ;;  %v1117_v30 = vld [vmem:[#allocation10 + $0x38] sm:$0xff]  }
  0x5c   :  { %997 = vmatprep.subr.bf16.mxu0 %v1084_v34  ;;  %v1120_v34 = vld [vmem:[#allocation10 + $0x20] sm:$0xff]  }
  0x5e   :  { %481 = vmatpush2.bf16.msra.mxu1 %v416_v40  ;;  %451 = vmatmul.mubr.bf16.vlgmr.msra.gmra.mxu0 %v117_v39 }
  0x5f   :  { %998 = vmatpush3.bf16.msra.mxu0 %v1085_v41  ;;  %482 = vmatprep.subr.bf16.mxu1 %v1266_v0 }
  0x60   :  { %999 = vmatprep.subr.bf16.mxu0 %v1087_v42  ;;  %709 = vmatprep.mubr.bf16.mxu0 %v106_v43 }
  0x62   :  { %483 = vmatpush2.bf16.msra.mxu1 %v1086_v44 }
  0x63   :  { %1000 = vmatpush3.bf16.msra.mxu0 %v1088_v45  ;;  %484 = vmatprep.subr.bf16.mxu1 %v1266_v0 }
  0x64   :  { %1001 = vmatprep.subr.bf16.mxu0 %v1090_v46 }
  0x66   :  { %485 = vmatpush2.bf16.msra.mxu1 %v1089_v47 }
  0x67   :  { %1002 = vmatpush3.bf16.msra.mxu0 %v1091_v48  ;;  %486 = vmatprep.subr.bf16.mxu1 %v1266_v0 }
  0x68   :  { %1003 = vmatprep.subr.bf16.mxu0 %v1093_v51 }
  0x6a   :  { %487 = vmatpush2.bf16.msra.mxu1 %v1092_v56 }
  0x6b   :  { %1004 = vmatpush3.bf16.msra.mxu0 %v1094_v59  ;;  %488 = vmatprep.subr.bf16.mxu1 %v1266_v0 }
  0x6c   :  { %1005 = vmatprep.subr.bf16.mxu0 %v1096_v60 }
  0x6e   :  { %489 = vmatpush2.bf16.msra.mxu1 %v1095_v63 }
  0x6f   :  { %1006 = vmatpush3.bf16.msra.mxu0 %v1097_v3  ;;  %717 = vmatprep.subr.bf16.mxu1 %v1266_v0  ;;  %v966_v3 = vld [vmem:[%s1405_s5 + $0x1] ss:$0 sm:$0xff]  ;;  %s1231_s5 = scalar_lea.vmem %s895_s24, 128 }
  0x70   :  { %1007 = vmatprep.subr.bf16.mxu0 %v1098_v4  ;;  %p1232_p11 = scmp.ne.s32.totalorder %s895_s24, %s1231_s5  ;;  %p1237_p13 = scmp.lt.s32.totalorder %s1231_s5, %s1231_s5 }
  0x71   :  { %491 = vmatmul.mubr.bf16.vlgmr.msra.gmra.mxu1 %v119_v5 }
  0x72   :  { %718 = vmatpush1.bf16.msra.mxu1 %v1099_v7  ;;  %964 = vmatprep.mubr.msk.bf16.mxu1 %vm410_vm1, %v108_v6  ;;  %p1238_p0 = por %p1237_p13, %p1236_p12 }
  0x73   :  { %1008 = vmatpush3.bf16.msra.mxu0 %v1100_v8  ;;  %719 = vmatprep.subr.bf16.mxu1 %v1266_v0 }
  0x74   :  { %1009 = vmatprep.subr.bf16.mxu0 %v1101_v9  ;;  %p1239_p1 = pnand %p1238_p0, %p1232_p11 }
  0x76   :  { %720 = vmatpush1.bf16.msra.mxu1 %v1102_v10 }
  0x77   :  { %1010 = vmatpush3.bf16.msra.mxu0 %v1103_v11  ;;  %721 = vmatprep.subr.bf16.mxu1 %v1266_v0 }
  0x78   :  { %1011 = vmatprep.subr.bf16.mxu0 %v1104_v12 }
  0x7a   :  { %722 = vmatpush1.bf16.msra.mxu1 %v1105_v14 }
  0x7b   :  { %1012 = vmatpush3.bf16.msra.mxu0 %v1106_v15  ;;  %723 = vmatprep.subr.bf16.mxu1 %v1266_v0 }
  0x7c   :  { %1028 = vmatprep.subr.bf16.mxu0 %v1267_v31 }
  0x7e   :  { %710 = vmatmul.mubr.bf16.vlgmr.msra.gmra.mxu0 %v105_v17  ;;  %724 = vmatpush1.bf16.msra.mxu1 %v1107_v16 }
  0x7f   :  { %725 = vmatprep.subr.bf16.mxu1 %v1266_v0  ;;  %1029 = vmatpush3.bf16.msra.mxu0 %v1117_v30 }
  0x80   :  { %1030 = vmatprep.subr.bf16.mxu0 %v1267_v31  ;;  %1044 = vmatprep.mubr.msk.bf16.mxu0 %vm1268_vm2, %v1267_v31 }
  0x82   :  { %726 = vmatpush1.bf16.msra.mxu1 %v1108_v18 }
  0x83   :  { %727 = vmatprep.subr.bf16.mxu1 %v1266_v0  ;;  %1031 = vmatpush3.bf16.msra.mxu0 %v1118_v32 }
  0x84   :  { %1032 = vmatprep.subr.bf16.mxu0 %v1267_v31 }
  0x86   :  { %728 = vmatpush1.bf16.msra.mxu1 %v1109_v19 }
  0x87   :  { %729 = vmatprep.subr.bf16.mxu1 %v1266_v0  ;;  %1033 = vmatpush3.bf16.msra.mxu0 %v1119_v33 }
  0x88   :  { %1034 = vmatprep.subr.bf16.mxu0 %v1267_v31 }
  0x8a   :  { %730 = vmatpush1.bf16.msra.mxu1 %v1110_v20 }
  0x8b   :  { %731 = vmatprep.subr.bf16.mxu1 %v1266_v0  ;;  %1035 = vmatpush3.bf16.msra.mxu0 %v1120_v34 }
  0x8c   :  { %1036 = vmatprep.subr.bf16.mxu0 %v1267_v31 }
  0x8e   :  { %732 = vmatpush1.bf16.msra.mxu1 %v1111_v21 }
  0x8f   :  { %739 = vmatprep.subr.bf16.mxu1 %v1266_v0  ;;  %1037 = vmatpush3.bf16.msra.mxu0 %v1121_v35 }
  0x90   :  { %1038 = vmatprep.subr.bf16.mxu0 %v1267_v31 }
  0x92   :  { %740 = vmatpush2.bf16.msra.mxu1 %v675_v23 }
  0x93   :  { %741 = vmatprep.subr.bf16.mxu1 %v1266_v0 }
  0x96   :  { %742 = vmatpush2.bf16.msra.mxu1 %v1113_v24 }
  0x97   :  { %743 = vmatprep.subr.bf16.mxu1 %v1266_v0 }
  0x9a   :  { %744 = vmatpush2.bf16.msra.mxu1 %v1114_v25 }
  0x9b   :  { %745 = vmatprep.subr.bf16.mxu1 %v1266_v0 }
  0x9e   :  { %746 = vmatpush2.bf16.msra.mxu1 %v1115_v26 }
  0x9f   :  { %747 = vmatprep.subr.bf16.mxu1 %v1266_v0  ;;  %v1122_v0 = vld [vmem:[#allocation10 + $0x10] sm:$0xff]  }
  0xa0   :  { %1039 = vmatpush3.bf16.msra.mxu0 %v1122_v0 }
  0xa1   :  { %1040 = vmatprep.subr.bf16.mxu0 %v1267_v31 }
  0xa2   :  { %748 = vmatpush2.bf16.msra.mxu1 %v1116_v28 }
  0xa4   :  { %1041 = vmatpush3.bf16.msra.mxu0 %v1123_v36 }
  0xa5   :  { %750 = vmatmul.mubr.bf16.vlgmr.msra.gmra.mxu1 %v107_v29  ;;  %1042 = vmatprep.subr.bf16.mxu0 %v1267_v31 }
  0xa8   :  { %1043 = vmatpush3.bf16.msra.mxu0 %v1124_v37 }
 0x11e   :  { %v991_v38 = vpop.f32.mrf.mxu0 }
 0x120   :  { %v992_v39 = vpop.f32.mrf.mxu0 }
 0x121   :  { %v993_v50 = vadd.f32 %v992_v39, %v991_v38 }
 0x122   :  { %v994_v40 = vpop.f32.mrf.mxu0 }
 0x124   :  { %v995_v41 = vpop.f32.mrf.mxu0 }
 0x131   :  { %v492_v42 = vpop.f32.mrf.mxu1 }
 0x132   :  { %v493_v52 = vadd.f32 %v993_v50, %v492_v42 }
 0x133   :  { %v494_v43 = vpop.f32.mrf.mxu1 }
 0x135   :  { %v495_v44 = vpop.f32.mrf.mxu1 }
 0x137   :  { %v496_v45 = vpop.f32.mrf.mxu1 }
 0x13e   :  { %v1013_v46 = vpop.f32.mrf.mxu0 }
 0x140   :  { %v1014_v47 = vpop.f32.mrf.mxu0 }
 0x141   :  { %v1015_v51 = vadd.f32 %v1014_v47, %v1013_v46 }
 0x142   :  { %v1016_v48 = vpop.f32.mrf.mxu0 }
 0x143   :  { %v712_v53 = vadd.f32 %v1015_v51, %v493_v52 }
 0x144   :  { %v1017_v49 = vpop.f32.mrf.mxu0 }
 0x165   :  { %v751_v54 = vpop.f32.mrf.mxu1 }
 0x166   :  { %v752_v56 = vadd.f32 %v751_v54, %v712_v53 }
 0x167   :  { %v753_v57 = vpop.f32.mrf.mxu1 }
 0x168   :  { %v762_v58 = vadd.f32 %v965_v55, %v752_v56 }
 0x169   :  { %v754_v59 = vpop.f32.mrf.mxu1 }
 0x16a   :  { %v763_v60 = vmul.f32 0.5, %v762_v58 }
 0x16b   :  { %v755_v61 = vpop.f32.mrf.mxu1 }
 0x16c   :  { %1125 = vtanh.f32 %v763_v60 }
 0x179   :  { %v1126_v62 = vpop.eup %1125 }
 0x17a   :  { %v765_v63 = vmul.f32 0.5, %v1126_v62 }
 0x17c   :  { %v766_v1 = vadd.f32 0.5, %v765_v63 }
 0x17e   :  { %v767_v2 = vpack.c.bf16 %v766_v1, %v766_v1 }
 0x180   :  { %1045 = vmatmul.mubr.bf16.vlgmr.msra.gmra.mxu0 %v767_v2 }
 0x240   :  { %v871_v4 = vpop.f32.mrf.mxu0 }
 0x241   :  { %v872_v5 = vadd.f32 %v966_v3, %v871_v4 }
 0x242   :  { %v1046_v6 = vpop.f32.mrf.mxu0 }
 0x243   :  { %877 = vmax.xlane.f32.xlu0 %v872_v5 }
 0x244   :  { %v874_v7 = vpop.f32.mrf.mxu0 }
 0x246   :  { %v1047_v8 = vpop.f32.mrf.mxu0 }
 0x2cc   :  { %v878_v9 = vpop.xlane.xlu0 %877 }
 0x2cd   :  { %v879_v10 = vsub.f32 %v872_v5, %v878_v9 }
 0x2cf   :  { %v880_v11 = vmul.f32 1.442695, %v879_v10 }
 0x2d1   :  { %1127 = vpow2.f32 %v880_v11 }
 0x2de   :  { %v1128_v12 = vpop.eup %1127 }
 0x2df   :  { %882 = vadd.xlane.f32.xlu0 %v1128_v12 }
 0x368   :  { %v883_v13 = vpop.xlane.xlu0 %882 }
 0x369   :  { %1129 = vlog2.f32 %v883_v13 }
 0x376   :  { %v1130_v14 = vpop.eup %1129 }
 0x377   :  { %v885_v15 = vmul.f32 0.6931472, %v1130_v14 }
 0x379   :  { %v886_v16 = vsub.f32 %v879_v10, %v885_v15 }
 0x37b   :  { %887 = vst [vmem:[#allocation11] sm:$0xff] %v886_v16 }
 0x37c   :  { %1242 = shalt.err (!%p1239_p1)
}
 0x37d   :  { %897 = dma.vmem_to_hbm [thread:$0]  %s895_s24, 128, %s1406_s6, [#allocation4]  }
 0x37e   :  { %1257 = dma.done.wait [#allocation4], 128  }
 0x37f   :  { %1258 = vsyncadd [#allocation4], 4294967168 }
 0x380   :  { %901 = vsyncpa [#allocation3], 1 }
 0x381   :  { %902 = vsyncpa [#allocation6], 1 }
 0x382   :  { %903 = vsyncpa [#allocation9], 1 }
 0x383   :  { %904 = vsyncpa [#allocation4], 1 }

</bundles_post_ra>
